<compile_context>
chip_gen: v7x
topology: tpu7x:2x2x1
jax: 0.10.0
libtpu: 0.0.40
codegen_flags: <defaults>
</compile_context>

<pallas_src>
import functools

import jax
import jax.numpy as jnp
from jax import lax
from jax.experimental import pallas as pl
from jax.experimental.pallas import tpu as pltpu

LANES = 128
SUBLANES = 8
CHUNK_ROWS = 256        # inner accumulation chunk (~128 KiB f32 of live temps)
PAD_SENTINEL = -1e4     # zero-loss sentinel: bce = 0, pt = 1, loss = 0 exactly


def _round_up(x, m):
    return -(-x // m) * m


def _sublane_packing(*dtypes):
    # Sub-32-bit dtypes pack along sublanes: f32 tile = 8 rows, bf16 = 16, int8 = 32.
    pack = SUBLANES
    for dt in dtypes:
        pack = max(pack, SUBLANES * (4 // max(1, jnp.dtype(dt).itemsize)))
    return pack


def _device_config():
    """(num_splits, max_block_rows) tuned per TPU generation."""
    kind = ""
    try:
        kind = jax.devices()[0].device_kind.lower()
    except Exception:
        pass
    if "v7" in kind:
        # 2 TensorCores, each with its own HBM path: shard across cores and use
        # 4 MiB (f32) input blocks -> 16 MiB double-buffered < 32 MiB scoped VMEM.
        return 2, 8192
    if "v5 lite" in kind or "v5lite" in kind or "v5e" in kind:
        # 16 MiB default scoped VMEM on v5e: 2 MiB blocks -> 8 MiB double-buffered.
        return 1, 4096
    # v6e / default: 1 MiB blocks already sit at ~85-86% of the HBM roofline.
    return 1, 2048


def _focal_loss_kernel(x_ref, y_ref, out_ref, *, gamma, block_rows, inner_rows,
                       blocks_per_split, num_full_blocks, rows_valid):
    c = pl.program_id(0)          # split (TensorCore) axis
    i = pl.program_id(1)          # reduction axis over row-blocks

    @pl.when(i == 0)
    def _():
        out_ref[...] = jnp.zeros_like(out_ref)

    # True (unclamped) block index: the index_map clamps the DMA source for
    # past-the-end blocks; the mask below uses the true index so any duplicated
    # (clamped) block contributes exactly zero.
    block_idx = c * blocks_per_split + i
    row_start = block_idx * block_rows
    num_chunks = block_rows // inner_rows

    def chunk_loss(r0):
        x = x_ref[pl.ds(r0, inner_rows), :].astype(jnp.float32)
        y = y_ref[pl.ds(r0, inner_rows), :].astype(jnp.float32)
        # Numerically stable BCE-with-logits (== F.binary_cross_entropy_with_logits):
        #   bce = max(x, 0) - x*y + log1p(exp(-|x|))
        e = jnp.exp(-jnp.abs(x))
        bce = jnp.maximum(x, 0.0) - x * y + jnp.log1p(e)
        pt = jnp.exp(-bce)
        one_minus_pt = 1.0 - pt
        if float(gamma) == int(gamma) and int(gamma) >= 0:
            mod = lax.integer_pow(one_minus_pt, int(gamma))  # multiply chain, no pow
        else:
            mod = one_minus_pt ** jnp.float32(gamma)
        return mod * bce          # alpha is folded into the wrapper's final scalar

    def accumulate(masked):
        def body(k, acc):
            r0 = pl.multiple_of(k * inner_rows, inner_rows)
            fl = chunk_loss(r0)
            if masked:
                gr = row_start + r0 + lax.broadcasted_iota(
                    jnp.int32, (inner_rows, LANES), 0)
                fl = jnp.where(gr < rows_valid, fl, 0.0)
            return acc + jnp.sum(
                fl.reshape(inner_rows // SUBLANES, SUBLANES, LANES), axis=0)
        return lax.fori_loop(0, num_chunks, body,
                             jnp.zeros((SUBLANES, LANES), jnp.float32),
                             unroll=True)

    # Only the (at most one per split) ragged / past-the-end block pays for the mask.
    @pl.when(block_idx < num_full_blocks)
    def _():
        out_ref[...] += accumulate(False)

    @pl.when(block_idx >= num_full_blocks)
    def _():
        out_ref[...] += accumulate(True)


@functools.partial(jax.jit, static_argnames=("alpha", "gamma", "reduction"))
def binary_focal_loss(logits, targets, alpha=1.0, gamma=2.0, reduction="mean"):
    assert logits.shape == targets.shape
    if reduction not in ("mean", "sum"):
        raise ValueError(f"unsupported reduction: {reduction}")

    n = int(logits.size)                       # static under jit
    num_splits, max_block_rows = _device_config()

    # Inputs are streamed at native width (kernel upcasts in VMEM); no wrapper cast.
    flat_x = jnp.ravel(logits)                 # layout-preserving (free) reshape
    flat_y = jnp.ravel(targets)
    n128 = _round_up(n, LANES)
    if n128 != n:
        # TODO(synk): rare non-multiple-of-128 tail; this pad is the only remaining
        # full-array copy (a prefix slice would copy just as much). The zero-loss
        # sentinel keeps the result exact.
        flat_x = jnp.pad(flat_x, (0, n128 - n), constant_values=PAD_SENTINEL)
        flat_y = jnp.pad(flat_y, (0, n128 - n))
    rows = n128 // LANES
    x2d = flat_x.reshape(rows, LANES)
    y2d = flat_y.reshape(rows, LANES)

    packing = _sublane_packing(x2d.dtype, y2d.dtype)
    rows_per_split = -(-rows // num_splits)
    block_rows = min(max_block_rows, _round_up(rows_per_split, packing))
    inner_rows = min(block_rows, CHUNK_ROWS)
    block_rows = _round_up(block_rows, inner_rows)

    blocks_total = -(-rows // block_rows)
    blocks_per_split = -(-blocks_total // num_splits)
    num_full_blocks = rows // block_rows       # blocks fully inside the array

    if num_splits == 1:
        in_map = lambda c, i: (i, 0)
    else:
        # Clamp the DMA source for past-the-end blocks of the last split; their
        # contribution is masked to zero inside the kernel.
        in_map = lambda c, i: (jnp.minimum(c * blocks_per_split + i,
                                           blocks_total - 1), 0)

    kernel = functools.partial(
        _focal_loss_kernel,
        gamma=float(gamma), block_rows=block_rows, inner_rows=inner_rows,
        blocks_per_split=blocks_per_split, num_full_blocks=num_full_blocks,
        rows_valid=rows)

    dim_sem = ((pltpu.CORE_PARALLEL if num_splits > 1 else pltpu.ARBITRARY),
               pltpu.ARBITRARY)

    partial_sums = pl.pallas_call(
        kernel,
        out_shape=jax.ShapeDtypeStruct((num_splits * SUBLANES, LANES), jnp.float32),
        grid_spec=pltpu.PrefetchScalarGridSpec(
            num_scalar_prefetch=0,
            grid=(num_splits, blocks_per_split),
            in_specs=[
                pl.BlockSpec((block_rows, LANES), in_map),
                pl.BlockSpec((block_rows, LANES), in_map),
            ],
            out_specs=pl.BlockSpec((SUBLANES, LANES), lambda c, i: (c, 0)),
        ),
        compiler_params=pltpu.CompilerParams(dimension_semantics=dim_sem),
    )(x2d, y2d)

    total = jnp.sum(partial_sums) * jnp.float32(alpha)
    if reduction == "mean":
        return total / jnp.float32(n)
    return total


def _reference(logits, targets, alpha=1.0, gamma=2.0):
    x = logits.astype(jnp.float32)
    y = targets.astype(jnp.float32)
    bce = jnp.maximum(x, 0.0) - x * y + jnp.log1p(jnp.exp(-jnp.abs(x)))
    pt = jnp.exp(-bce)
    return jnp.mean(alpha * (1.0 - pt) ** gamma * bce)


if __name__ == "__main__":
    key = jax.random.PRNGKey(0)
    k1, k2 = jax.random.split(key)
    # NCHW-shaped logits, binary targets (typical BinaryFocalLoss usage).
    x = jax.random.normal(k1, (2, 4, 16, 16), dtype=jnp.float32)
    t = (jax.random.uniform(k2, (2, 4, 16, 16)) > 0.5).astype(jnp.float32)

    loss = binary_focal_loss(x, t, alpha=1.0, gamma=2.0, reduction="mean")
    loss = jax.block_until_ready(loss)

    ref = _reference(x, t)
    assert jnp.allclose(loss, ref, rtol=1e-5, atol=1e-6), (loss, ref)
    print("KERNEL_OK")
</pallas_src>

<mosaic_0001>
module attributes {stable_mosaic.version = 11 : i64} {
  func.func @_focal_loss_kernel(%arg0: i32, %arg1: i32, %arg2: memref<16x128xf32, #tpu.memory_space<vmem>>, %arg3: memref<16x128xf32, #tpu.memory_space<vmem>>, %arg4: memref<8x128xf32, #tpu.memory_space<vmem>>) attributes {dimension_semantics = [#tpu.dimension_semantics<arbitrary>, #tpu.dimension_semantics<arbitrary>], iteration_bounds = array<i64: 1, 1>, scalar_prefetch = 0 : i64, scratch_operands = 0 : i64, tpu.core_type = #tpu.core_type<tc>, window_params = [{transform_indices = @transform_0, window_bounds = array<i64: 16, 128>}, {transform_indices = @transform_1, window_bounds = array<i64: 16, 128>}, {transform_indices = @transform_2, window_bounds = array<i64: 8, 128>}]} {
    %c0_i32 = arith.constant 0 : i32
    %0 = arith.cmpi eq, %arg1, %c0_i32 : i32
    %1 = arith.extui %0 : i1 to i32
    %c0_i32_0 = arith.constant 0 : i32
    %2 = arith.cmpi ne, %1, %c0_i32_0 : i32
    scf.if %2 {
      %cst = arith.constant 0.000000e+00 : f32
      %12 = vector.broadcast %cst : f32 to vector<8x128xf32>
      %c0 = arith.constant 0 : index
      %c0_5 = arith.constant 0 : index
      %13 = vector.load %arg4[%c0, %c0_5] : memref<8x128xf32, #tpu.memory_space<vmem>>, vector<8x128xf32>
      tpu.vector_store %arg4[%c0, %c0_5], %12 {strides = array<i32>} : memref<8x128xf32, #tpu.memory_space<vmem>>, vector<8x128xf32>,
    } else {
    }
    %c1_i32 = arith.constant 1 : i32
    %3 = arith.muli %arg0, %c1_i32 : i32
    %4 = arith.addi %3, %arg1 : i32
    %c16_i32 = arith.constant 16 : i32
    %5 = arith.muli %4, %c16_i32 : i32
    %c1_i32_1 = arith.constant 1 : i32
    %6 = arith.cmpi slt, %4, %c1_i32_1 : i32
    %7 = arith.extui %6 : i1 to i32
    %c0_i32_2 = arith.constant 0 : i32
    %8 = arith.cmpi ne, %7, %c0_i32_2 : i32
    scf.if %8 {
      %c0 = arith.constant 0 : index
      %c0_5 = arith.constant 0 : index
      %12 = vector.load %arg4[%c0, %c0_5] : memref<8x128xf32, #tpu.memory_space<vmem>>, vector<8x128xf32>
      %cst = arith.constant 0.000000e+00 : f32
      %13 = vector.broadcast %cst : f32 to vector<8x128xf32>
      %c0_i32_6 = arith.constant 0 : i32
      %c16_i32_7 = arith.constant 16 : i32
      %14 = arith.muli %c0_i32_6, %c16_i32_7 : i32
      %15 = tpu.assume_multiple %14, 16 : i32
      %16 = arith.index_cast %15 : i32 to index
      %c0_8 = arith.constant 0 : index
      %17 = vector.load %arg2[%16, %c0_8] : memref<16x128xf32, #tpu.memory_space<vmem>>, vector<16x128xf32>
      %18 = arith.index_cast %15 : i32 to index
      %c0_9 = arith.constant 0 : index
      %19 = vector.load %arg3[%18, %c0_9] : memref<16x128xf32, #tpu.memory_space<vmem>>, vector<16x128xf32>
      %20 = math.absf %17 : vector<16x128xf32>
      %cst_10 = arith.constant 0.000000e+00 : f32
      %21 = vector.broadcast %cst_10 : f32 to vector<16x128xf32>
      %22 = arith.subf %21, %20 : vector<16x128xf32>
      %23 = math.exp %22 : vector<16x128xf32>
      %cst_11 = arith.constant 0.000000e+00 : f32
      %24 = vector.broadcast %cst_11 : f32 to vector<16x128xf32>
      %25 = arith.maximumf %17, %24 : vector<16x128xf32>
      %26 = arith.mulf %17, %19 : vector<16x128xf32>
      %27 = arith.subf %25, %26 : vector<16x128xf32>
      %28 = math.log1p %23 : vector<16x128xf32>
      %29 = arith.addf %27, %28 : vector<16x128xf32>
      %cst_12 = arith.constant 0.000000e+00 : f32
      %30 = vector.broadcast %cst_12 : f32 to vector<16x128xf32>
      %31 = arith.subf %30, %29 : vector<16x128xf32>
      %32 = math.exp %31 : vector<16x128xf32>
      %cst_13 = arith.constant 1.000000e+00 : f32
      %33 = vector.broadcast %cst_13 : f32 to vector<16x128xf32>
      %34 = arith.subf %33, %32 : vector<16x128xf32>
      %35 = arith.mulf %34, %34 : vector<16x128xf32>
      %36 = arith.mulf %35, %29 : vector<16x128xf32>
      %37 = vector.shape_cast %36 : vector<16x128xf32> to vector<2x8x128xf32>
      %cst_14 = arith.constant dense<0.000000e+00> : vector<8x128xf32>
      %38 = vector.multi_reduction <add>, %37, %cst_14 [0] : vector<2x8x128xf32> to vector<8x128xf32>
      %39 = arith.addf %13, %38 : vector<8x128xf32>
      %c1_i32_15 = arith.constant 1 : i32
      %40 = arith.addf %12, %39 : vector<8x128xf32>
      %c0_16 = arith.constant 0 : index
      %c0_17 = arith.constant 0 : index
      %41 = vector.load %arg4[%c0_16, %c0_17] : memref<8x128xf32, #tpu.memory_space<vmem>>, vector<8x128xf32>
      tpu.vector_store %arg4[%c0_16, %c0_17], %40 {strides = array<i32>} : memref<8x128xf32, #tpu.memory_space<vmem>>, vector<8x128xf32>,
    } else {
    }
    %c1_i32_3 = arith.constant 1 : i32
    %9 = arith.cmpi sge, %4, %c1_i32_3 : i32
    %10 = arith.extui %9 : i1 to i32
    %c0_i32_4 = arith.constant 0 : i32
    %11 = arith.cmpi ne, %10, %c0_i32_4 : i32
    scf.if %11 {
      %c0 = arith.constant 0 : index
      %c0_5 = arith.constant 0 : index
      %12 = vector.load %arg4[%c0, %c0_5] : memref<8x128xf32, #tpu.memory_space<vmem>>, vector<8x128xf32>
      %cst = arith.constant 0.000000e+00 : f32
      %13 = vector.broadcast %cst : f32 to vector<8x128xf32>
      %c0_i32_6 = arith.constant 0 : i32
      %c16_i32_7 = arith.constant 16 : i32
      %14 = arith.muli %c0_i32_6, %c16_i32_7 : i32
      %15 = tpu.assume_multiple %14, 16 : i32
      %16 = arith.index_cast %15 : i32 to index
      %c0_8 = arith.constant 0 : index
      %17 = vector.load %arg2[%16, %c0_8] : memref<16x128xf32, #tpu.memory_space<vmem>>, vector<16x128xf32>
      %18 = arith.index_cast %15 : i32 to index
      %c0_9 = arith.constant 0 : index
      %19 = vector.load %arg3[%18, %c0_9] : memref<16x128xf32, #tpu.memory_space<vmem>>, vector<16x128xf32>
      %20 = math.absf %17 : vector<16x128xf32>
      %cst_10 = arith.constant 0.000000e+00 : f32
      %21 = vector.broadcast %cst_10 : f32 to vector<16x128xf32>
      %22 = arith.subf %21, %20 : vector<16x128xf32>
      %23 = math.exp %22 : vector<16x128xf32>
      %cst_11 = arith.constant 0.000000e+00 : f32
      %24 = vector.broadcast %cst_11 : f32 to vector<16x128xf32>
      %25 = arith.maximumf %17, %24 : vector<16x128xf32>
      %26 = arith.mulf %17, %19 : vector<16x128xf32>
      %27 = arith.subf %25, %26 : vector<16x128xf32>
      %28 = math.log1p %23 : vector<16x128xf32>
      %29 = arith.addf %27, %28 : vector<16x128xf32>
      %cst_12 = arith.constant 0.000000e+00 : f32
      %30 = vector.broadcast %cst_12 : f32 to vector<16x128xf32>
      %31 = arith.subf %30, %29 : vector<16x128xf32>
      %32 = math.exp %31 : vector<16x128xf32>
      %cst_13 = arith.constant 1.000000e+00 : f32
      %33 = vector.broadcast %cst_13 : f32 to vector<16x128xf32>
      %34 = arith.subf %33, %32 : vector<16x128xf32>
      %35 = arith.mulf %34, %34 : vector<16x128xf32>
      %36 = arith.mulf %35, %29 : vector<16x128xf32>
      %37 = arith.addi %5, %15 : i32
      %38 = tpu.iota {dimensions = array<i32: 0>} : vector<16x128xi32>
      %39 = vector.broadcast %37 : i32 to vector<16x128xi32>
      %40 = arith.addi %39, %38 : vector<16x128xi32>
      %c16_i32_14 = arith.constant 16 : i32
      %41 = vector.broadcast %c16_i32_14 : i32 to vector<16x128xi32>
      %42 = arith.cmpi slt, %40, %41 : vector<16x128xi32>
      %cst_15 = arith.constant 0.000000e+00 : f32
      %43 = vector.broadcast %cst_15 : f32 to vector<16x128xf32>
      %44 = arith.select %42, %36, %43 : vector<16x128xi1>, vector<16x128xf32>
      %45 = vector.shape_cast %44 : vector<16x128xf32> to vector<2x8x128xf32>
      %cst_16 = arith.constant dense<0.000000e+00> : vector<8x128xf32>
      %46 = vector.multi_reduction <add>, %45, %cst_16 [0] : vector<2x8x128xf32> to vector<8x128xf32>
      %47 = arith.addf %13, %46 : vector<8x128xf32>
      %c1_i32_17 = arith.constant 1 : i32
      %48 = arith.addf %12, %47 : vector<8x128xf32>
      %c0_18 = arith.constant 0 : index
      %c0_19 = arith.constant 0 : index
      %49 = vector.load %arg4[%c0_18, %c0_19] : memref<8x128xf32, #tpu.memory_space<vmem>>, vector<8x128xf32>
      tpu.vector_store %arg4[%c0_18, %c0_19], %48 {strides = array<i32>} : memref<8x128xf32, #tpu.memory_space<vmem>>, vector<8x128xf32>,
    } else {
    }
    return
  }
  func.func @transform_0(%arg0: i32, %arg1: i32) -> (i32, i32) {
    %c0_i32 = arith.constant 0 : i32
    %c0_i32_0 = arith.constant 0 : i32
    return %arg1, %c0_i32 : i32, i32
  }
  func.func @transform_1(%arg0: i32, %arg1: i32) -> (i32, i32) {
    %c0_i32 = arith.constant 0 : i32
    %c0_i32_0 = arith.constant 0 : i32
    return %arg1, %c0_i32 : i32, i32
  }
  func.func @transform_2(%arg0: i32, %arg1: i32) -> (i32, i32) {
    %c0_i32 = arith.constant 0 : i32
    %c0_i32_0 = arith.constant 0 : i32
    return %arg0, %c0_i32 : i32, i32
  }
}

</mosaic_0001>

<bundles_post_ra>
// kernel: binary_focal_loss.1
= control target key start
LH: loop header
LB: loop body
LE: loop exit
PB: predicated region body
PF: predicated region fallthrough
CT: control target
= control target key end

     0   :  { %s194_s0 = inlined_call_operand.vmem [shape: f32[16,128], index: 0, kind: input, shape index: {}]   ;;  %s195_s1 = inlined_call_operand.vmem [shape: f32[16,128], index: 1, kind: input, shape index: {}]   ;;  %s196_s2 = inlined_call_operand.vmem [shape: f32[8,128], index: 2, kind: output, shape index: {}]  }
   0x1   :  { %v23_v0 = vld [vmem:[%s194_s0] sm:$0xff]  ;;  %v24_v1 = vld [vmem:[%s194_s0 + $0x8] sm:$0xff] }
   0x2   :  { %v27_v2 = vand.u32 2147483647, %v23_v0  ;;  %v28_v3 = vand.u32 2147483647, %v24_v1  ;;  %v25_v14 = vld [vmem:[%s195_s1] sm:$0xff]  ;;  %v26_v15 = vld [vmem:[%s195_s1 + $0x8] sm:$0xff] }
   0x3   :  { %v35_v17 = vmax.f32 %v23_v0, 0.0  ;;  %v37_v18 = vmul.f32 %v25_v14, %v23_v0  ;;  %v36_v21 = vmax.f32 %v24_v1, 0.0  ;;  %v38_v22 = vmul.f32 %v26_v15, %v24_v1 }
   0x4   :  { %v29_v4 = vsub.f32 0.0, %v27_v2  ;;  %v30_v5 = vsub.f32 0.0, %v28_v3 }
   0x5   :  { %v39_v26 = vsub.f32 %v35_v17, %v37_v18  ;;  %v40_v29 = vsub.f32 %v36_v21, %v38_v22 }
   0x6   :  { %v31_v6 = vmul.f32 1.442695, %v29_v4  ;;  %v33_v7 = vmul.f32 1.442695, %v30_v5 }
   0x8   :  { %152 = vpow2.f32 %v31_v6 }
   0x9   :  { %154 = vpow2.f32 %v33_v7 }
  0x12   :  { %v153_v8 = vpop.eup %152 }
  0x13   :  { %v155_v9 = vpop.eup %154  ;;  %v41_v10 = vadd.f32 1.0, %v153_v8  ;;  %v44_v12 = vmul.f32 -0.5, %v153_v8  ;;  %v47_v19 = vand.u32 2147483647, %v153_v8 }
  0x14   :  { %v50_v11 = vadd.f32 1.0, %v155_v9  ;;  %v53_v13 = vmul.f32 -0.5, %v155_v9  ;;  %v56_v23 = vand.u32 2147483647, %v155_v9 }
  0x15   :  { %156 = vlog2.f32 %v41_v10  ;;  %v45_v16 = vadd.f32 1.0, %v44_v12  ;;  %vm48_vm0 = vcmp.lt.f32.partialorder %v47_v19, 0.0004427343 }
  0x16   :  { %158 = vlog2.f32 %v50_v11  ;;  %v54_v20 = vadd.f32 1.0, %v53_v13  ;;  %vm57_vm1 = vcmp.lt.f32.partialorder %v56_v23, 0.0004427343 }
  0x17   :  { %v46_v24 = vmul.f32 %v153_v8, %v45_v16 }
  0x18   :  { %v55_v27 = vmul.f32 %v155_v9, %v54_v20 }
  0x1f   :  { %v157_v25 = vpop.eup %156 }
  0x20   :  { %v159_v28 = vpop.eup %158  ;;  %v43_v30 = vmul.f32 0.6931472, %v157_v25 }
  0x21   :  { %v52_v31 = vmul.f32 0.6931472, %v159_v28 }
  0x22   :  { %v49_v32 = vsel %vm48_vm0, %v46_v24, %v43_v30 }
  0x23   :  { %v58_v33 = vsel %vm57_vm1, %v55_v27, %v52_v31  ;;  %v59_v34 = vadd.f32 %v49_v32, %v39_v26 }
  0x24   :  { %v60_v35 = vadd.f32 %v58_v33, %v40_v29 }
  0x25   :  { %v61_v36 = vsub.f32 0.0, %v59_v34 }
  0x26   :  { %v62_v37 = vsub.f32 0.0, %v60_v35 }
  0x27   :  { %v63_v38 = vmul.f32 1.442695, %v61_v36 }
  0x28   :  { %v65_v39 = vmul.f32 1.442695, %v62_v37 }
  0x29   :  { %160 = vpow2.f32 %v63_v38 }
  0x2a   :  { %162 = vpow2.f32 %v65_v39 }
  0x33   :  { %v161_v40 = vpop.eup %160 }
  0x34   :  { %v163_v41 = vpop.eup %162  ;;  %v67_v42 = vsub.f32 1.0, %v161_v40 }
  0x35   :  { %v68_v43 = vsub.f32 1.0, %v163_v41 }
  0x36   :  { %v69_v44 = vmul.f32 %v67_v42, %v67_v42 }
  0x37   :  { %v70_v45 = vmul.f32 %v68_v43, %v68_v43 }
  0x38   :  { %v71_v46 = vmul.f32 %v69_v44, %v59_v34 }
  0x39   :  { %v72_v47 = vmul.f32 %v70_v45, %v60_v35 }
  0x3b   :  { %v73_v48 = vadd.f32 %v72_v47, %v71_v46 }
  0x3d   :  { %76 = vst [vmem:[%s196_s2] sm:$0xff] %v73_v48 }

</bundles_post_ra>
